<compile_context>
chip_gen: v6e
topology: v6e:2x2x1
jax: 0.10.0
libtpu: 0.0.40
codegen_flags: <defaults>
</compile_context>

<pallas_src>
import functools

import jax
import jax.numpy as jnp
from jax.experimental import pallas as pl
from jax.experimental.pallas import tpu as pltpu


# ----------------------------------------------------------------------------- helpers
def _round_up(x, m):
    return ((x + m - 1) // m) * m


def _pad_to(a, shape):
    pads = [(0, s - d) for d, s in zip(a.shape, shape)]
    return jnp.pad(a, pads)


def _device_kind():
    try:
        return jax.devices()[0].device_kind.lower()
    except Exception:
        return ""


def _bf16_activations():
    # v6e / v7x have bf16 VPU + EUP paths; keep f32 activations elsewhere (v5e etc.).
    kind = _device_kind()
    return ("v6" in kind) or ("v7" in kind)


def _vmem_limit_bytes():
    # Per-generation VMEM budget: ~100 MiB on 128 MiB parts (v5e/v6e),
    # 48 MiB of headroom on v7x's 64 MiB.
    try:
        cap = pltpu.get_tpu_info().vmem_capacity_bytes
    except Exception:
        cap = 64 * 1024 * 1024
    if cap >= 120 * 1024 * 1024:
        return 100 * 1024 * 1024
    return 48 * 1024 * 1024


def _pick_batch_tile(B, tb):
    """Sublane-aligned batch tile; >=2 grid steps for moderate/large batches."""
    tb = _round_up(max(int(tb), 8), 8)
    b8 = _round_up(B, 8)
    if b8 <= 128:
        return b8                              # tiny batch: single grid step
    half = max(_round_up((B + 1) // 2, 8), 128)  # at least 2 steps (v7x megacore)
    return min(tb, half, b8)


# ----------------------------------------------------------------------------- kernel
def decoder_kernel(z_ref,
                   w1_ref, b1_ref,
                   w2_ref, b2_ref,
                   w3_ref, b3_ref,
                   out_ref, *, bf16_act):
    """Fused FCN decoder tile: tanh(zW1+b1) -> tanh(.W2+b2) -> sigmoid(.W3+b3).

    Matmul inputs are bf16 with f32 accumulation; activation math runs in bf16
    on chips with bf16 VPU/EUP (v6e/v7x), f32 otherwise.
    """
    act_dt = jnp.bfloat16 if bf16_act else jnp.float32
    z = z_ref[...]                                                  # bf16 (TB, L)

    h = jnp.dot(z, w1_ref[...], preferred_element_type=jnp.float32)
    h = jnp.tanh((h + b1_ref[...]).astype(act_dt)).astype(jnp.bfloat16)

    h = jnp.dot(h, w2_ref[...], preferred_element_type=jnp.float32)
    h = jnp.tanh((h + b2_ref[...]).astype(act_dt)).astype(jnp.bfloat16)

    o = jnp.dot(h, w3_ref[...], preferred_element_type=jnp.float32)
    o = (o + b3_ref[...]).astype(act_dt)
    # sigmoid(x) = 0.5 * tanh(x / 2) + 0.5  -> one EUP push per element, exact.
    out_ref[...] = (0.5 * jnp.tanh(0.5 * o) + 0.5).astype(out_ref.dtype)


# ----------------------------------------------------------------------------- wrapper
def prepare_decoder_params(params):
    """One-time pad-to-128-lanes + bf16 cast of the decoder weights/biases.

    Zero padding keeps the math exact: padded hidden lanes see zero weight
    columns, tanh(0)=0, and feed zero weight rows downstream; padded output
    lanes are sliced off after the kernel.
    """
    (w1, b1), (w2, b2), (w3, b3) = params
    L, H1 = w1.shape
    H2 = w2.shape[1]
    O = w3.shape[1]
    H1p, H2p, Op = _round_up(H1, 128), _round_up(H2, 128), _round_up(O, 128)
    return dict(
        latent_dim=L, observed_dim=O, padded_out=Op,
        w1=_pad_to(w1, (L, H1p)).astype(jnp.bfloat16),          # K = L left unpadded
        b1=_pad_to(b1.reshape(1, -1), (1, H1p)).astype(jnp.float32),
        w2=_pad_to(w2, (H1p, H2p)).astype(jnp.bfloat16),
        b2=_pad_to(b2.reshape(1, -1), (1, H2p)).astype(jnp.float32),
        w3=_pad_to(w3, (H2p, Op)).astype(jnp.bfloat16),
        b3=_pad_to(b3.reshape(1, -1), (1, Op)).astype(jnp.float32),
    )


def decoder_forward(z, prepared, *, tb=512, out_dtype=jnp.bfloat16):
    """Batch-tiled pallas_call; weights stay resident in VMEM across grid steps."""
    B, L = z.shape
    assert L == prepared["latent_dim"], "latent dim mismatch"
    O, Op = prepared["observed_dim"], prepared["padded_out"]
    w1, b1 = prepared["w1"], prepared["b1"]
    w2, b2 = prepared["w2"], prepared["b2"]
    w3, b3 = prepared["w3"], prepared["b3"]
    H1p, H2p = w1.shape[1], w2.shape[1]

    TB = _pick_batch_tile(B, tb)
    Bp = _round_up(B, TB)
    zp = _pad_to(z, (Bp, L)).astype(jnp.bfloat16)
    grid = (Bp // TB,)

    cost = pl.CostEstimate(
        flops=2 * Bp * (L * H1p + H1p * H2p + H2p * Op),
        transcendentals=Bp * (H1p + H2p + Op),
        bytes_accessed=(zp.size * 2
                        + (w1.size + w2.size + w3.size) * 2
                        + (b1.size + b2.size + b3.size) * 4
                        + Bp * Op * jnp.dtype(out_dtype).itemsize),
    )

    kernel = functools.partial(decoder_kernel, bf16_act=_bf16_activations())

    def build(single_buffer_weights):
        if single_buffer_weights:
            # Constant index_map -> never re-fetched; single buffer halves their
            # VMEM footprint (matters on v7x's 64 MiB VMEM).
            resident = lambda a: pl.BlockSpec(a.shape, lambda i: (0, 0),
                                              pipeline_mode=pl.Buffered(1))
        else:
            resident = lambda a: pl.BlockSpec(a.shape, lambda i: (0, 0))
        return pl.pallas_call(
            kernel,
            out_shape=jax.ShapeDtypeStruct((Bp, Op), out_dtype),
            grid=grid,
            in_specs=[pl.BlockSpec((TB, L), lambda i: (i, 0)),   # z tile, pipelined
                      resident(w1), resident(b1),
                      resident(w2), resident(b2),
                      resident(w3), resident(b3)],
            out_specs=pl.BlockSpec((TB, Op), lambda i: (i, 0)),  # lane-dense bf16 store
            compiler_params=pltpu.CompilerParams(
                dimension_semantics=("parallel",),               # v7x: 2-TC sharding
                vmem_limit_bytes=_vmem_limit_bytes(),
            ),
            cost_estimate=cost,
        )

    try:
        out_p = build(True)(zp, w1, b1, w2, b2, w3, b3)
    except Exception:
        # Fallback if pipeline_mode=Buffered(1) is rejected by this lowering.
        out_p = build(False)(zp, w1, b1, w2, b2, w3, b3)

    return out_p[:B, :O]


# ----------------------------------------------------------------------------- reference / init
def init_params(key, latent_dim, hidden_dim, observed_dim):
    """Deterministic init matching torch.nn.Linear default U(-1/sqrt(fan_in), +)."""
    dims = [(latent_dim, hidden_dim),
            (hidden_dim, hidden_dim),
            (hidden_dim, observed_dim)]
    params = []
    for (fan_in, fan_out) in dims:
        key, kw, kb = jax.random.split(key, 3)
        bound = 1.0 / jnp.sqrt(fan_in)
        w = jax.random.uniform(kw, (fan_in, fan_out), jnp.float32, -bound, bound)
        b = jax.random.uniform(kb, (1, fan_out), jnp.float32, -bound, bound)
        params.append((w, b))
    return params


def decoder_reference(z, params):
    """Pure-JAX f32 reference for correctness check."""
    (w1, b1), (w2, b2), (w3, b3) = params
    h = jnp.tanh(z @ w1 + b1)
    h = jnp.tanh(h @ w2 + b2)
    return jax.nn.sigmoid(h @ w3 + b3)


if __name__ == "__main__":
    # Small shapes consistent with an AEVB decoder.
    batch = 8
    latent_dim = 8
    hidden_dim = 32
    observed_dim = 64

    key = jax.random.PRNGKey(0)
    key, kz = jax.random.split(key)
    z = jax.random.normal(kz, (batch, latent_dim), jnp.float32)

    params = init_params(key, latent_dim, hidden_dim, observed_dim)
    prepared = prepare_decoder_params(params)   # pad/cast once, reused per call

    out = jax.block_until_ready(decoder_forward(z, prepared))
    ref = decoder_reference(z, params)
    assert out.shape == (batch, observed_dim)
    # bf16 matmuls/activations/output vs pure-f32 reference -> loosened tolerance.
    assert jnp.allclose(out.astype(jnp.float32), ref, atol=2e-2, rtol=0.0), \
        "mismatch vs reference (small batch)"

    # Larger batch: exercises batch padding + multi-step grid (pipelined z/out tiles).
    key, kz2 = jax.random.split(key)
    z2 = jax.random.normal(kz2, (144, latent_dim), jnp.float32)
    out2 = jax.block_until_ready(decoder_forward(z2, prepared))
    ref2 = decoder_reference(z2, params)
    assert out2.shape == (144, observed_dim)
    assert jnp.allclose(out2.astype(jnp.float32), ref2, atol=2e-2, rtol=0.0), \
        "mismatch vs reference (multi-tile batch)"

    print("KERNEL_OK")
</pallas_src>

<mosaic_0001>
module attributes {stable_mosaic.version = 11 : i64} {
  func.func @decoder_kernel(%arg0: i32, %arg1: memref<8x8xbf16, #tpu.memory_space<vmem>>, %arg2: memref<8x128xbf16, #tpu.memory_space<vmem>>, %arg3: memref<1x128xf32, #tpu.memory_space<vmem>>, %arg4: memref<128x128xbf16, #tpu.memory_space<vmem>>, %arg5: memref<1x128xf32, #tpu.memory_space<vmem>>, %arg6: memref<128x128xbf16, #tpu.memory_space<vmem>>, %arg7: memref<1x128xf32, #tpu.memory_space<vmem>>, %arg8: memref<8x128xbf16, #tpu.memory_space<vmem>>) attributes {dimension_semantics = [#tpu.dimension_semantics<parallel>], iteration_bounds = array<i64: 1>, scalar_prefetch = 0 : i64, scratch_operands = 0 : i64, tpu.core_type = #tpu.core_type<tc>, window_params = [{transform_indices = @transform_0, window_bounds = array<i64: 8, 8>}, {pipeline_mode = #tpu.pipeline_mode<synchronous>, transform_indices = @transform_1, window_bounds = array<i64: 8, 128>}, {pipeline_mode = #tpu.pipeline_mode<synchronous>, transform_indices = @transform_2, window_bounds = array<i64: 1, 128>}, {pipeline_mode = #tpu.pipeline_mode<synchronous>, transform_indices = @transform_3, window_bounds = array<i64: 128, 128>}, {pipeline_mode = #tpu.pipeline_mode<synchronous>, transform_indices = @transform_4, window_bounds = array<i64: 1, 128>}, {pipeline_mode = #tpu.pipeline_mode<synchronous>, transform_indices = @transform_5, window_bounds = array<i64: 128, 128>}, {pipeline_mode = #tpu.pipeline_mode<synchronous>, transform_indices = @transform_6, window_bounds = array<i64: 1, 128>}, {transform_indices = @transform_7, window_bounds = array<i64: 8, 128>}]} {
    %c0 = arith.constant 0 : index
    %c0_0 = arith.constant 0 : index
    %0 = vector.load %arg1[%c0, %c0_0] : memref<8x8xbf16, #tpu.memory_space<vmem>>, vector<8x8xbf16>
    %c0_1 = arith.constant 0 : index
    %c0_2 = arith.constant 0 : index
    %1 = vector.load %arg2[%c0_1, %c0_2] : memref<8x128xbf16, #tpu.memory_space<vmem>>, vector<8x128xbf16>
    %cst = arith.constant dense<0.000000e+00> : vector<8x128xf32>
    %2 = tpu.matmul %0, %1, %cst {dimension_numbers = #tpu.dot_dimension_numbers<[1], [0], [0], [1], [0, 0, 1, 1], [], []>} : vector<8x8xbf16>, vector<8x128xbf16>, vector<8x128xf32> -> vector<8x128xf32>
    %c0_3 = arith.constant 0 : index
    %c0_4 = arith.constant 0 : index
    %3 = vector.load %arg3[%c0_3, %c0_4] : memref<1x128xf32, #tpu.memory_space<vmem>>, vector<1x128xf32>
    %4 = vector.broadcast %3 : vector<1x128xf32> to vector<8x128xf32>
    %5 = arith.addf %2, %4 : vector<8x128xf32>
    %6 = math.tanh %5 : vector<8x128xf32>
    %7 = arith.truncf %6 : vector<8x128xf32> to vector<8x128xbf16>
    %c0_5 = arith.constant 0 : index
    %c0_6 = arith.constant 0 : index
    %8 = vector.load %arg4[%c0_5, %c0_6] : memref<128x128xbf16, #tpu.memory_space<vmem>>, vector<128x128xbf16>
    %cst_7 = arith.constant dense<0.000000e+00> : vector<8x128xf32>
    %9 = tpu.matmul %7, %8, %cst_7 {dimension_numbers = #tpu.dot_dimension_numbers<[1], [0], [0], [1], [0, 0, 1, 1], [], []>} : vector<8x128xbf16>, vector<128x128xbf16>, vector<8x128xf32> -> vector<8x128xf32>
    %c0_8 = arith.constant 0 : index
    %c0_9 = arith.constant 0 : index
    %10 = vector.load %arg5[%c0_8, %c0_9] : memref<1x128xf32, #tpu.memory_space<vmem>>, vector<1x128xf32>
    %11 = vector.broadcast %10 : vector<1x128xf32> to vector<8x128xf32>
    %12 = arith.addf %9, %11 : vector<8x128xf32>
    %13 = math.tanh %12 : vector<8x128xf32>
    %14 = arith.truncf %13 : vector<8x128xf32> to vector<8x128xbf16>
    %c0_10 = arith.constant 0 : index
    %c0_11 = arith.constant 0 : index
    %15 = vector.load %arg6[%c0_10, %c0_11] : memref<128x128xbf16, #tpu.memory_space<vmem>>, vector<128x128xbf16>
    %cst_12 = arith.constant dense<0.000000e+00> : vector<8x128xf32>
    %16 = tpu.matmul %14, %15, %cst_12 {dimension_numbers = #tpu.dot_dimension_numbers<[1], [0], [0], [1], [0, 0, 1, 1], [], []>} : vector<8x128xbf16>, vector<128x128xbf16>, vector<8x128xf32> -> vector<8x128xf32>
    %c0_13 = arith.constant 0 : index
    %c0_14 = arith.constant 0 : index
    %17 = vector.load %arg7[%c0_13, %c0_14] : memref<1x128xf32, #tpu.memory_space<vmem>>, vector<1x128xf32>
    %18 = vector.broadcast %17 : vector<1x128xf32> to vector<8x128xf32>
    %19 = arith.addf %16, %18 : vector<8x128xf32>
    %cst_15 = arith.constant 5.000000e-01 : f32
    %20 = vector.broadcast %cst_15 : f32 to vector<8x128xf32>
    %21 = arith.mulf %20, %19 : vector<8x128xf32>
    %22 = math.tanh %21 : vector<8x128xf32>
    %cst_16 = arith.constant 5.000000e-01 : f32
    %23 = vector.broadcast %cst_16 : f32 to vector<8x128xf32>
    %24 = arith.mulf %23, %22 : vector<8x128xf32>
    %cst_17 = arith.constant 5.000000e-01 : f32
    %25 = vector.broadcast %cst_17 : f32 to vector<8x128xf32>
    %26 = arith.addf %24, %25 : vector<8x128xf32>
    %27 = arith.truncf %26 : vector<8x128xf32> to vector<8x128xbf16>
    %c0_18 = arith.constant 0 : index
    %c0_19 = arith.constant 0 : index
    %28 = vector.load %arg8[%c0_18, %c0_19] : memref<8x128xbf16, #tpu.memory_space<vmem>>, vector<8x128xbf16>
    tpu.vector_store %arg8[%c0_18, %c0_19], %27 {strides = array<i32>} : memref<8x128xbf16, #tpu.memory_space<vmem>>, vector<8x128xbf16>,
    return
  }
  func.func @transform_0(%arg0: i32) -> (i32, i32) {
    %c0_i32 = arith.constant 0 : i32
    %c0_i32_0 = arith.constant 0 : i32
    return %arg0, %c0_i32 : i32, i32
  }
  func.func @transform_1(%arg0: i32) -> (i32, i32) {
    %c0_i32 = arith.constant 0 : i32
    %c0_i32_0 = arith.constant 0 : i32
    %c0_i32_1 = arith.constant 0 : i32
    return %c0_i32, %c0_i32_0 : i32, i32
  }
  func.func @transform_2(%arg0: i32) -> (i32, i32) {
    %c0_i32 = arith.constant 0 : i32
    %c0_i32_0 = arith.constant 0 : i32
    %c0_i32_1 = arith.constant 0 : i32
    return %c0_i32, %c0_i32_0 : i32, i32
  }
  func.func @transform_3(%arg0: i32) -> (i32, i32) {
    %c0_i32 = arith.constant 0 : i32
    %c0_i32_0 = arith.constant 0 : i32
    %c0_i32_1 = arith.constant 0 : i32
    return %c0_i32, %c0_i32_0 : i32, i32
  }
  func.func @transform_4(%arg0: i32) -> (i32, i32) {
    %c0_i32 = arith.constant 0 : i32
    %c0_i32_0 = arith.constant 0 : i32
    %c0_i32_1 = arith.constant 0 : i32
    return %c0_i32, %c0_i32_0 : i32, i32
  }
  func.func @transform_5(%arg0: i32) -> (i32, i32) {
    %c0_i32 = arith.constant 0 : i32
    %c0_i32_0 = arith.constant 0 : i32
    %c0_i32_1 = arith.constant 0 : i32
    return %c0_i32, %c0_i32_0 : i32, i32
  }
  func.func @transform_6(%arg0: i32) -> (i32, i32) {
    %c0_i32 = arith.constant 0 : i32
    %c0_i32_0 = arith.constant 0 : i32
    %c0_i32_1 = arith.constant 0 : i32
    return %c0_i32, %c0_i32_0 : i32, i32
  }
  func.func @transform_7(%arg0: i32) -> (i32, i32) {
    %c0_i32 = arith.constant 0 : i32
    %c0_i32_0 = arith.constant 0 : i32
    return %arg0, %c0_i32 : i32, i32
  }
}

module attributes {stable_mosaic.version = 11 : i64} {
  func.func @decoder_kernel(%arg0: i32, %arg1: memref<8x8xbf16, #tpu.memory_space<vmem>>, %arg2: memref<8x128xbf16, #tpu.memory_space<vmem>>, %arg3: memref<1x128xf32, #tpu.memory_space<vmem>>, %arg4: memref<128x128xbf16, #tpu.memory_space<vmem>>, %arg5: memref<1x128xf32, #tpu.memory_space<vmem>>, %arg6: memref<128x128xbf16, #tpu.memory_space<vmem>>, %arg7: memref<1x128xf32, #tpu.memory_space<vmem>>, %arg8: memref<8x128xbf16, #tpu.memory_space<vmem>>) attributes {dimension_semantics = [#tpu.dimension_semantics<parallel>], iteration_bounds = array<i64: 1>, scalar_prefetch = 0 : i64, scratch_operands = 0 : i64, tpu.core_type = #tpu.core_type<tc>, window_params = [{transform_indices = @transform_0, window_bounds = array<i64: 8, 8>}, {pipeline_mode = #tpu.pipeline_mode<synchronous>, transform_indices = @transform_1, window_bounds = array<i64: 8, 128>}, {pipeline_mode = #tpu.pipeline_mode<synchronous>, transform_indices = @transform_2, window_bounds = array<i64: 1, 128>}, {pipeline_mode = #tpu.pipeline_mode<synchronous>, transform_indices = @transform_3, window_bounds = array<i64: 128, 128>}, {pipeline_mode = #tpu.pipeline_mode<synchronous>, transform_indices = @transform_4, window_bounds = array<i64: 1, 128>}, {pipeline_mode = #tpu.pipeline_mode<synchronous>, transform_indices = @transform_5, window_bounds = array<i64: 128, 128>}, {pipeline_mode = #tpu.pipeline_mode<synchronous>, transform_indices = @transform_6, window_bounds = array<i64: 1, 128>}, {transform_indices = @transform_7, window_bounds = array<i64: 8, 128>}]} {
    %c0 = arith.constant 0 : index
    %c0_0 = arith.constant 0 : index
    %0 = vector.load %arg1[%c0, %c0_0] : memref<8x8xbf16, #tpu.memory_space<vmem>>, vector<8x8xbf16>
    %c0_1 = arith.constant 0 : index
    %c0_2 = arith.constant 0 : index
    %1 = vector.load %arg2[%c0_1, %c0_2] : memref<8x128xbf16, #tpu.memory_space<vmem>>, vector<8x128xbf16>
    %cst = arith.constant dense<0.000000e+00> : vector<8x128xf32>
    %2 = tpu.matmul %0, %1, %cst {dimension_numbers = #tpu.dot_dimension_numbers<[1], [0], [0], [1], [0, 0, 1, 1], [], []>} : vector<8x8xbf16>, vector<8x128xbf16>, vector<8x128xf32> -> vector<8x128xf32>
    %c0_3 = arith.constant 0 : index
    %c0_4 = arith.constant 0 : index
    %3 = vector.load %arg3[%c0_3, %c0_4] : memref<1x128xf32, #tpu.memory_space<vmem>>, vector<1x128xf32>
    %4 = vector.broadcast %3 : vector<1x128xf32> to vector<8x128xf32>
    %5 = arith.addf %2, %4 : vector<8x128xf32>
    %6 = math.tanh %5 : vector<8x128xf32>
    %7 = arith.truncf %6 : vector<8x128xf32> to vector<8x128xbf16>
    %c0_5 = arith.constant 0 : index
    %c0_6 = arith.constant 0 : index
    %8 = vector.load %arg4[%c0_5, %c0_6] : memref<128x128xbf16, #tpu.memory_space<vmem>>, vector<128x128xbf16>
    %cst_7 = arith.constant dense<0.000000e+00> : vector<8x128xf32>
    %9 = tpu.matmul %7, %8, %cst_7 {dimension_numbers = #tpu.dot_dimension_numbers<[1], [0], [0], [1], [0, 0, 1, 1], [], []>} : vector<8x128xbf16>, vector<128x128xbf16>, vector<8x128xf32> -> vector<8x128xf32>
    %c0_8 = arith.constant 0 : index
    %c0_9 = arith.constant 0 : index
    %10 = vector.load %arg5[%c0_8, %c0_9] : memref<1x128xf32, #tpu.memory_space<vmem>>, vector<1x128xf32>
    %11 = vector.broadcast %10 : vector<1x128xf32> to vector<8x128xf32>
    %12 = arith.addf %9, %11 : vector<8x128xf32>
    %13 = math.tanh %12 : vector<8x128xf32>
    %14 = arith.truncf %13 : vector<8x128xf32> to vector<8x128xbf16>
    %c0_10 = arith.constant 0 : index
    %c0_11 = arith.constant 0 : index
    %15 = vector.load %arg6[%c0_10, %c0_11] : memref<128x128xbf16, #tpu.memory_space<vmem>>, vector<128x128xbf16>
    %cst_12 = arith.constant dense<0.000000e+00> : vector<8x128xf32>
    %16 = tpu.matmul %14, %15, %cst_12 {dimension_numbers = #tpu.dot_dimension_numbers<[1], [0], [0], [1], [0, 0, 1, 1], [], []>} : vector<8x128xbf16>, vector<128x128xbf16>, vector<8x128xf32> -> vector<8x128xf32>
    %c0_13 = arith.constant 0 : index
    %c0_14 = arith.constant 0 : index
    %17 = vector.load %arg7[%c0_13, %c0_14] : memref<1x128xf32, #tpu.memory_space<vmem>>, vector<1x128xf32>
    %18 = vector.broadcast %17 : vector<1x128xf32> to vector<8x128xf32>
    %19 = arith.addf %16, %18 : vector<8x128xf32>
    %cst_15 = arith.constant 5.000000e-01 : f32
    %20 = vector.broadcast %cst_15 : f32 to vector<8x128xf32>
    %21 = arith.mulf %20, %19 : vector<8x128xf32>
    %22 = math.tanh %21 : vector<8x128xf32>
    %cst_16 = arith.constant 5.000000e-01 : f32
    %23 = vector.broadcast %cst_16 : f32 to vector<8x128xf32>
    %24 = arith.mulf %23, %22 : vector<8x128xf32>
    %cst_17 = arith.constant 5.000000e-01 : f32
    %25 = vector.broadcast %cst_17 : f32 to vector<8x128xf32>
    %26 = arith.addf %24, %25 : vector<8x128xf32>
    %27 = arith.truncf %26 : vector<8x128xf32> to vector<8x128xbf16>
    %c0_18 = arith.constant 0 : index
    %c0_19 = arith.constant 0 : index
    %28 = vector.load %arg8[%c0_18, %c0_19] : memref<8x128xbf16, #tpu.memory_space<vmem>>, vector<8x128xbf16>
    tpu.vector_store %arg8[%c0_18, %c0_19], %27 {strides = array<i32>} : memref<8x128xbf16, #tpu.memory_space<vmem>>, vector<8x128xbf16>,
    return
  }
  func.func @transform_0(%arg0: i32) -> (i32, i32) {
    %c0_i32 = arith.constant 0 : i32
    %c0_i32_0 = arith.constant 0 : i32
    return %arg0, %c0_i32 : i32, i32
  }
  func.func @transform_1(%arg0: i32) -> (i32, i32) {
    %c0_i32 = arith.constant 0 : i32
    %c0_i32_0 = arith.constant 0 : i32
    %c0_i32_1 = arith.constant 0 : i32
    return %c0_i32, %c0_i32_0 : i32, i32
  }
  func.func @transform_2(%arg0: i32) -> (i32, i32) {
    %c0_i32 = arith.constant 0 : i32
    %c0_i32_0 = arith.constant 0 : i32
    %c0_i32_1 = arith.constant 0 : i32
    return %c0_i32, %c0_i32_0 : i32, i32
  }
  func.func @transform_3(%arg0: i32) -> (i32, i32) {
    %c0_i32 = arith.constant 0 : i32
    %c0_i32_0 = arith.constant 0 : i32
    %c0_i32_1 = arith.constant 0 : i32
    return %c0_i32, %c0_i32_0 : i32, i32
  }
  func.func @transform_4(%arg0: i32) -> (i32, i32) {
    %c0_i32 = arith.constant 0 : i32
    %c0_i32_0 = arith.constant 0 : i32
    %c0_i32_1 = arith.constant 0 : i32
    return %c0_i32, %c0_i32_0 : i32, i32
  }
  func.func @transform_5(%arg0: i32) -> (i32, i32) {
    %c0_i32 = arith.constant 0 : i32
    %c0_i32_0 = arith.constant 0 : i32
    %c0_i32_1 = arith.constant 0 : i32
    return %c0_i32, %c0_i32_0 : i32, i32
  }
  func.func @transform_6(%arg0: i32) -> (i32, i32) {
    %c0_i32 = arith.constant 0 : i32
    %c0_i32_0 = arith.constant 0 : i32
    %c0_i32_1 = arith.constant 0 : i32
    return %c0_i32, %c0_i32_0 : i32, i32
  }
  func.func @transform_7(%arg0: i32) -> (i32, i32) {
    %c0_i32 = arith.constant 0 : i32
    %c0_i32_0 = arith.constant 0 : i32
    return %arg0, %c0_i32 : i32, i32
  }
}

</mosaic_0001>

<bundles_post_ra>
// kernel: tpu_custom_call.1
= control target key start
LH: loop header
LB: loop body
LE: loop exit
PB: predicated region body
PF: predicated region fallthrough
CT: control target
= control target key end

     0   :  { %12 = vsyncpa [#allocation3], 0  ;;  %s706_s0 = inlined_call_operand.hbm [shape: bf16[8,8], index: 0, kind: input, shape index: {}]   ;;  %s707_s1 = inlined_call_operand.hbm [shape: bf16[8,128], index: 1, kind: input, shape index: {}]   ;;  %s708_s2 = inlined_call_operand.vmem [shape: f32[1,128], index: 2, kind: input, shape index: {}]   ;;  %s709_s3 = inlined_call_operand.hbm [shape: bf16[128,128], index: 3, kind: input, shape index: {}]   ;;  %s710_s4 = inlined_call_operand.vmem [shape: f32[1,128], index: 4, kind: input, shape index: {}]   ;;  %s711_s5 = inlined_call_operand.hbm [shape: bf16[128,128], index: 5, kind: input, shape index: {}]   ;;  %s712_s6 = inlined_call_operand.vmem [shape: f32[1,128], index: 6, kind: input, shape index: {}]   ;;  %s713_s7 = inlined_call_operand.hbm [shape: bf16[8,128], index: 7, kind: output, shape index: {}]  }
   0x1   :  { %13 = vsyncpa [#allocation6], 0 }
   0x2   :  { %14 = vsyncpa [#allocation9], 0 }
   0x3   :  { %15 = vsyncpa [#allocation4], 0  ;;  %s610_s24 = smov [#allocation5]   ;;  %s611_s26 = smov [#allocation2]  }
   0x4   :  { %s32_s25 = sshll.u32 %s610_s24, 4  ;;  %s22_s27 = sshll.u32 %s611_s26, 4  ;;  %s33_s25 = int_to_ptr.vmem [resolvable:$true] %s32_s25  ;;  %s23_s27 = int_to_ptr.vmem [resolvable:$true] %s22_s27 }
   0x5   :  { %s510_s28 = scalar_lea.vmem %s33_s25, 64  ;;  %p515_p1 = scmp.lt.s32.totalorder %s33_s25, %s33_s25 }
   0x6   :  { %p511_p0 = scmp.ne.s32.totalorder %s33_s25, %s510_s28  ;;  %p516_p2 = scmp.lt.s32.totalorder %s510_s28, %s510_s28 }
   0x8   :  { %p517_p3 = por %p516_p2, %p515_p1 }
   0xa   :  { %p518_p4 = pnand %p517_p3, %p511_p0 }
   0xc   :  { %521 = shalt.err (!%p518_p4)
}
   0xd   :  { %35 = dma.hbm_to_vmem [thread:$0]  %s707_s1, 64, %s33_s25, [#allocation6]  }
   0xe   :  { %s530_s8 = scalar_lea.vmem %s23_s27, 64  ;;  %p535_p6 = scmp.lt.s32.totalorder %s23_s27, %s23_s27 }
   0xf   :  { %p531_p5 = scmp.ne.s32.totalorder %s23_s27, %s530_s8  ;;  %p536_p7 = scmp.lt.s32.totalorder %s530_s8, %s530_s8 }
  0x11   :  { %p537_p8 = por %p536_p7, %p535_p6 }
  0x13   :  { %p538_p9 = pnand %p537_p8, %p531_p5 }
  0x15   :  { %541 = shalt.err (!%p538_p9)
}
  0x16   :  { %25 = dma.hbm_to_vmem [thread:$0]  %s706_s0, 64, %s23_s27, [#allocation3]  }
  0x17   :  { %s612_s11 = smov [#allocation7]  }
  0x18   :  { %s43_s12 = sshll.u32 %s612_s11, 4  ;;  %s44_s12 = int_to_ptr.vmem [resolvable:$true] %s43_s12 }
  0x19   :  { %s550_s13 = scalar_lea.vmem %s44_s12, 1024  ;;  %p555_p11 = scmp.lt.s32.totalorder %s44_s12, %s44_s12 }
  0x1a   :  { %p551_p10 = scmp.ne.s32.totalorder %s44_s12, %s550_s13  ;;  %p556_p12 = scmp.lt.s32.totalorder %s550_s13, %s550_s13 }
  0x1c   :  { %p557_p13 = por %p556_p12, %p555_p11 }
  0x1e   :  { %p558_p0 = pnand %p557_p13, %p551_p10 }
  0x20   :  { %561 = shalt.err (!%p558_p0)
}
  0x21   :  { %s613_s1 = smov 64   ;;  %s614_s14 = smov 4  }
  0x22   :  { %49 = dma.hbm_to_vmem [thread:$0]  %s709_s3, 1024, %s44_s12, [#allocation6], %s613_s1, %s613_s1, %s614_s14  }
  0x23   :  { %s615_s17 = smov [#allocation8]  }
  0x24   :  { %s57_s18 = sshll.u32 %s615_s17, 4  ;;  %s58_s18 = int_to_ptr.vmem [resolvable:$true] %s57_s18 }
  0x25   :  { %s570_s0 = scalar_lea.vmem %s58_s18, 1024  ;;  %p575_p2 = scmp.lt.s32.totalorder %s58_s18, %s58_s18 }
  0x26   :  { %p571_p1 = scmp.ne.s32.totalorder %s58_s18, %s570_s0  ;;  %p576_p3 = scmp.lt.s32.totalorder %s570_s0, %s570_s0 }
  0x28   :  { %p577_p4 = por %p576_p3, %p575_p2 }
  0x2a   :  { %p578_p5 = pnand %p577_p4, %p571_p1 }
  0x2c   :  { %581 = shalt.err (!%p578_p5)
}
  0x2d   :  { %63 = dma.hbm_to_vmem [thread:$0]  %s711_s5, 1024, %s58_s18, [#allocation9], %s613_s1, %s613_s1, %s614_s14  }
  0x2e   :  { %602 = dma.done.wait [#allocation3], 64  }
  0x2f   :  { %603 = vsyncadd [#allocation3], 4294967232 }
  0x30   :  { %604 = dma.done.wait [#allocation6], 1088  }
  0x31   :  { %605 = vsyncadd [#allocation6], 4294966208 }
  0x32   :  { %606 = dma.done.wait [#allocation9], 1024  }
  0x33   :  { %607 = vsyncadd [#allocation9], 4294966272  ;;  %v616_v0 = vmov 0.0   ;;  %vm617_vm0 = vmmov 0   ;;  %vm92_vm1 = vcmask 1043456   ;;  %vm88_vm2 = vcmask 64512  }
  0x34   :  { %425 = vmatprep.subr.bf16.mxu0 %v616_v0  ;;  %427 = vmatprep.mubr.msk.bf16.mxu0 %vm617_vm0, %v616_v0  ;;  %v80_v1 = vld [vmem:[#allocation5] sm:$0xf]  ;;  %v79_v4 = vld [vmem:[#allocation2] sm:$0xf]  ;;  %v481_v5 = vld [vmem:[#allocation7 + $0x30] sm:$0xff]  }
  0x35   :  { %431 = vmatprep.subr.bf16.mxu1 %v616_v0  ;;  %447 = vmatprep.mubr.msk.bf16.mxu1 %vm617_vm0, %v616_v0  ;;  %v94_v2 = vsel %vm92_vm1, %v80_v1, 0  ;;  %v480_v3 = vld [vmem:[#allocation7 + $0x38] sm:$0xff]   ;;  %v482_v6 = vld [vmem:[#allocation7 + $0x28] sm:$0xff]   ;;  %v483_v7 = vld [vmem:[#allocation7 + $0x20] sm:$0xff]  }
  0x36   :  { %426 = vmatpush3.bf16.msra.mxu0 %v94_v2  ;;  %432 = vmatpush3.bf16.msra.mxu1 %v480_v3  ;;  %v484_v8 = vld [vmem:[#allocation7 + $0x18] sm:$0xff]   ;;  %v485_v9 = vld [vmem:[#allocation7 + $0x10] sm:$0xff]   ;;  %v486_v10 = vld [vmem:[#allocation7 + $0x8] sm:$0xff]  }
  0x37   :  { %451 = vmatprep.subr.bf16.mxu0 %v616_v0  ;;  %433 = vmatprep.subr.bf16.mxu1 %v616_v0  ;;  %v487_v11 = vld [vmem:[#allocation7] sm:$0xff]   ;;  %v488_v12 = vld [vmem:[#allocation8 + $0x38] sm:$0xff]   ;;  %v489_v13 = vld [vmem:[#allocation8 + $0x30] sm:$0xff]  }
  0x38   :  { %v490_v14 = vld [vmem:[#allocation8 + $0x28] sm:$0xff]   ;;  %v385_v15 = vld [vmem:[%s708_s2] ss:$0 sm:$0xff]  ;;  %v491_v23 = vld [vmem:[#allocation8 + $0x20] sm:$0xff]  }
  0x39   :  { %428 = vmatmul.mubr.msk.bf16.vlgmr.msra.gmra.mxu0 %vm88_vm2, %v79_v4  ;;  %v492_v24 = vld [vmem:[#allocation8 + $0x18] sm:$0xff]   ;;  %v493_v25 = vld [vmem:[#allocation8 + $0x10] sm:$0xff]   ;;  %v494_v26 = vld [vmem:[#allocation8 + $0x8] sm:$0xff]  }
  0x3a   :  { %467 = vmatprep.mubr.msk.bf16.mxu0 %vm617_vm0, %v616_v0  ;;  %434 = vmatpush3.bf16.msra.mxu1 %v481_v5  ;;  %v495_v27 = vld [vmem:[#allocation8] sm:$0xff]   ;;  %v387_v28 = vld [vmem:[%s710_s4] ss:$0 sm:$0xff]  ;;  %s618_s4 = smov [#allocation10]  }
  0x3b   :  { %435 = vmatprep.subr.bf16.mxu1 %v616_v0  ;;  %452 = vmatpush3.bf16.msra.mxu0 %v488_v12  ;;  %v396_v36 = vld [vmem:[%s712_s6] ss:$0 sm:$0xff]  ;;  %s374_s24 = sshll.u32 %s618_s4, 4  ;;  %s375_s24 = int_to_ptr.vmem [resolvable:$true] %s374_s24 }
  0x3c   :  { %453 = vmatprep.subr.bf16.mxu0 %v616_v0  ;;  %s582_s25 = scalar_lea.vmem %s375_s24, 64  ;;  %p587_p7 = scmp.lt.s32.totalorder %s375_s24, %s375_s24 }
  0x3d   :  { %p583_p6 = scmp.ne.s32.totalorder %s375_s24, %s582_s25  ;;  %p588_p8 = scmp.lt.s32.totalorder %s582_s25, %s582_s25 }
  0x3e   :  { %436 = vmatpush3.bf16.msra.mxu1 %v482_v6 }
  0x3f   :  { %437 = vmatprep.subr.bf16.mxu1 %v616_v0  ;;  %454 = vmatpush3.bf16.msra.mxu0 %v489_v13  ;;  %p589_p9 = por %p588_p8, %p587_p7 }
  0x40   :  { %455 = vmatprep.subr.bf16.mxu0 %v616_v0 }
  0x41   :  { %p590_p10 = pnand %p589_p9, %p583_p6 }
  0x42   :  { %438 = vmatpush3.bf16.msra.mxu1 %v483_v7 }
  0x43   :  { %439 = vmatprep.subr.bf16.mxu1 %v616_v0  ;;  %456 = vmatpush3.bf16.msra.mxu0 %v490_v14 }
  0x44   :  { %457 = vmatprep.subr.bf16.mxu0 %v616_v0 }
  0x46   :  { %440 = vmatpush3.bf16.msra.mxu1 %v484_v8 }
  0x47   :  { %441 = vmatprep.subr.bf16.mxu1 %v616_v0  ;;  %458 = vmatpush3.bf16.msra.mxu0 %v491_v23 }
  0x48   :  { %459 = vmatprep.subr.bf16.mxu0 %v616_v0 }
  0x4a   :  { %442 = vmatpush3.bf16.msra.mxu1 %v485_v9 }
  0x4b   :  { %443 = vmatprep.subr.bf16.mxu1 %v616_v0  ;;  %460 = vmatpush3.bf16.msra.mxu0 %v492_v24 }
  0x4c   :  { %461 = vmatprep.subr.bf16.mxu0 %v616_v0 }
  0x4e   :  { %444 = vmatpush3.bf16.msra.mxu1 %v486_v10 }
  0x4f   :  { %445 = vmatprep.subr.bf16.mxu1 %v616_v0  ;;  %462 = vmatpush3.bf16.msra.mxu0 %v493_v25 }
  0x50   :  { %463 = vmatprep.subr.bf16.mxu0 %v616_v0 }
  0x52   :  { %446 = vmatpush3.bf16.msra.mxu1 %v487_v11 }
  0x53   :  { %464 = vmatpush3.bf16.msra.mxu0 %v494_v26 }
  0x54   :  { %465 = vmatprep.subr.bf16.mxu0 %v616_v0 }
  0x57   :  { %466 = vmatpush3.bf16.msra.mxu0 %v495_v27 }
  0xf9   :  { %v130_v16 = vpop.f32.mrf.mxu0 }
  0xfa   :  { %v131_v17 = vadd.f32 %v385_v15, %v130_v16 }
  0xfb   :  { %v429_v18 = vpop.f32.mrf.mxu0 }
  0xfc   :  { %496 = vtanh.f32 %v131_v17 }
  0xfd   :  { %v133_v19 = vpop.f32.mrf.mxu0 }
  0xff   :  { %v430_v20 = vpop.f32.mrf.mxu0 }
 0x109   :  { %v497_v21 = vpop.eup %496 }
 0x10a   :  { %v137_v22 = vpack.c.bf16 %v497_v21, %v497_v21 }
 0x10c   :  { %448 = vmatmul.mubr.bf16.vlgmr.msra.gmra.mxu1 %v137_v22 }
 0x1cc   :  { %v243_v29 = vpop.f32.mrf.mxu1 }
 0x1cd   :  { %v244_v30 = vadd.f32 %v387_v28, %v243_v29 }
 0x1ce   :  { %v449_v31 = vpop.f32.mrf.mxu1 }
 0x1cf   :  { %498 = vtanh.f32 %v244_v30 }
 0x1d0   :  { %v246_v32 = vpop.f32.mrf.mxu1 }
 0x1d2   :  { %v450_v33 = vpop.f32.mrf.mxu1 }
 0x1dc   :  { %v499_v34 = vpop.eup %498 }
 0x1dd   :  { %v250_v35 = vpack.c.bf16 %v499_v34, %v499_v34 }
 0x1df   :  { %468 = vmatmul.mubr.bf16.vlgmr.msra.gmra.mxu0 %v250_v35 }
 0x29f   :  { %v356_v37 = vpop.f32.mrf.mxu0 }
 0x2a0   :  { %v357_v38 = vadd.f32 %v396_v36, %v356_v37 }
 0x2a1   :  { %v469_v39 = vpop.f32.mrf.mxu0 }
 0x2a2   :  { %v362_v40 = vmul.f32 0.5, %v357_v38 }
 0x2a3   :  { %v359_v41 = vpop.f32.mrf.mxu0 }
 0x2a4   :  { %500 = vtanh.f32 %v362_v40 }
 0x2a5   :  { %v470_v42 = vpop.f32.mrf.mxu0 }
 0x2b1   :  { %v501_v43 = vpop.eup %500 }
 0x2b2   :  { %v364_v44 = vmul.f32 0.5, %v501_v43 }
 0x2b4   :  { %v365_v45 = vadd.f32 0.5, %v364_v44 }
 0x2b6   :  { %v366_v46 = vpack.c.bf16 %v365_v45, %v365_v45 }
 0x2b8   :  { %367 = vst [vmem:[#allocation10] sm:$0xf] %v366_v46 }
 0x2b9   :  { %593 = shalt.err (!%p590_p10)
}
 0x2ba   :  { %377 = dma.vmem_to_hbm [thread:$0]  %s375_s24, 64, %s713_s7, [#allocation4]  }
 0x2bb   :  { %608 = dma.done.wait [#allocation4], 64  }
 0x2bc   :  { %609 = vsyncadd [#allocation4], 4294967232 }
 0x2bd   :  { %381 = vsyncpa [#allocation3], 1 }
 0x2be   :  { %382 = vsyncpa [#allocation6], 1 }
 0x2bf   :  { %383 = vsyncpa [#allocation9], 1 }
 0x2c0   :  { %384 = vsyncpa [#allocation4], 1 }

// kernel: tpu_custom_call.1
= control target key start
LH: loop header
LB: loop body
LE: loop exit
PB: predicated region body
PF: predicated region fallthrough
CT: control target
= control target key end

     0   :  { %12 = vsyncpa [#allocation3], 0  ;;  %s706_s0 = inlined_call_operand.hbm [shape: bf16[8,8], index: 0, kind: input, shape index: {}]   ;;  %s707_s1 = inlined_call_operand.hbm [shape: bf16[8,128], index: 1, kind: input, shape index: {}]   ;;  %s708_s2 = inlined_call_operand.vmem [shape: f32[1,128], index: 2, kind: input, shape index: {}]   ;;  %s709_s3 = inlined_call_operand.hbm [shape: bf16[128,128], index: 3, kind: input, shape index: {}]   ;;  %s710_s4 = inlined_call_operand.vmem [shape: f32[1,128], index: 4, kind: input, shape index: {}]   ;;  %s711_s5 = inlined_call_operand.hbm [shape: bf16[128,128], index: 5, kind: input, shape index: {}]   ;;  %s712_s6 = inlined_call_operand.vmem [shape: f32[1,128], index: 6, kind: input, shape index: {}]   ;;  %s713_s7 = inlined_call_operand.hbm [shape: bf16[8,128], index: 7, kind: output, shape index: {}]  }
   0x1   :  { %13 = vsyncpa [#allocation6], 0 }
   0x2   :  { %14 = vsyncpa [#allocation9], 0 }
   0x3   :  { %15 = vsyncpa [#allocation4], 0  ;;  %s610_s24 = smov [#allocation5]   ;;  %s611_s26 = smov [#allocation2]  }
   0x4   :  { %s32_s25 = sshll.u32 %s610_s24, 4  ;;  %s22_s27 = sshll.u32 %s611_s26, 4  ;;  %s33_s25 = int_to_ptr.vmem [resolvable:$true] %s32_s25  ;;  %s23_s27 = int_to_ptr.vmem [resolvable:$true] %s22_s27 }
   0x5   :  { %s510_s28 = scalar_lea.vmem %s33_s25, 64  ;;  %p515_p1 = scmp.lt.s32.totalorder %s33_s25, %s33_s25 }
   0x6   :  { %p511_p0 = scmp.ne.s32.totalorder %s33_s25, %s510_s28  ;;  %p516_p2 = scmp.lt.s32.totalorder %s510_s28, %s510_s28 }
   0x8   :  { %p517_p3 = por %p516_p2, %p515_p1 }
   0xa   :  { %p518_p4 = pnand %p517_p3, %p511_p0 }
   0xc   :  { %521 = shalt.err (!%p518_p4)
}
   0xd   :  { %35 = dma.hbm_to_vmem [thread:$0]  %s707_s1, 64, %s33_s25, [#allocation6]  }
   0xe   :  { %s530_s8 = scalar_lea.vmem %s23_s27, 64  ;;  %p535_p6 = scmp.lt.s32.totalorder %s23_s27, %s23_s27 }
   0xf   :  { %p531_p5 = scmp.ne.s32.totalorder %s23_s27, %s530_s8  ;;  %p536_p7 = scmp.lt.s32.totalorder %s530_s8, %s530_s8 }
  0x11   :  { %p537_p8 = por %p536_p7, %p535_p6 }
  0x13   :  { %p538_p9 = pnand %p537_p8, %p531_p5 }
  0x15   :  { %541 = shalt.err (!%p538_p9)
}
  0x16   :  { %25 = dma.hbm_to_vmem [thread:$0]  %s706_s0, 64, %s23_s27, [#allocation3]  }
  0x17   :  { %s612_s11 = smov [#allocation7]  }
  0x18   :  { %s43_s12 = sshll.u32 %s612_s11, 4  ;;  %s44_s12 = int_to_ptr.vmem [resolvable:$true] %s43_s12 }
  0x19   :  { %s550_s13 = scalar_lea.vmem %s44_s12, 1024  ;;  %p555_p11 = scmp.lt.s32.totalorder %s44_s12, %s44_s12 }
  0x1a   :  { %p551_p10 = scmp.ne.s32.totalorder %s44_s12, %s550_s13  ;;  %p556_p12 = scmp.lt.s32.totalorder %s550_s13, %s550_s13 }
  0x1c   :  { %p557_p13 = por %p556_p12, %p555_p11 }
  0x1e   :  { %p558_p0 = pnand %p557_p13, %p551_p10 }
  0x20   :  { %561 = shalt.err (!%p558_p0)
}
  0x21   :  { %s613_s1 = smov 64   ;;  %s614_s14 = smov 4  }
  0x22   :  { %49 = dma.hbm_to_vmem [thread:$0]  %s709_s3, 1024, %s44_s12, [#allocation6], %s613_s1, %s613_s1, %s614_s14  }
  0x23   :  { %s615_s17 = smov [#allocation8]  }
  0x24   :  { %s57_s18 = sshll.u32 %s615_s17, 4  ;;  %s58_s18 = int_to_ptr.vmem [resolvable:$true] %s57_s18 }
  0x25   :  { %s570_s0 = scalar_lea.vmem %s58_s18, 1024  ;;  %p575_p2 = scmp.lt.s32.totalorder %s58_s18, %s58_s18 }
  0x26   :  { %p571_p1 = scmp.ne.s32.totalorder %s58_s18, %s570_s0  ;;  %p576_p3 = scmp.lt.s32.totalorder %s570_s0, %s570_s0 }
  0x28   :  { %p577_p4 = por %p576_p3, %p575_p2 }
  0x2a   :  { %p578_p5 = pnand %p577_p4, %p571_p1 }
  0x2c   :  { %581 = shalt.err (!%p578_p5)
}
  0x2d   :  { %63 = dma.hbm_to_vmem [thread:$0]  %s711_s5, 1024, %s58_s18, [#allocation9], %s613_s1, %s613_s1, %s614_s14  }
  0x2e   :  { %602 = dma.done.wait [#allocation3], 64  }
  0x2f   :  { %603 = vsyncadd [#allocation3], 4294967232 }
  0x30   :  { %604 = dma.done.wait [#allocation6], 1088  }
  0x31   :  { %605 = vsyncadd [#allocation6], 4294966208 }
  0x32   :  { %606 = dma.done.wait [#allocation9], 1024  }
  0x33   :  { %607 = vsyncadd [#allocation9], 4294966272  ;;  %v616_v0 = vmov 0.0   ;;  %vm617_vm0 = vmmov 0   ;;  %vm92_vm1 = vcmask 1043456   ;;  %vm88_vm2 = vcmask 64512  }
  0x34   :  { %425 = vmatprep.subr.bf16.mxu0 %v616_v0  ;;  %427 = vmatprep.mubr.msk.bf16.mxu0 %vm617_vm0, %v616_v0  ;;  %v80_v1 = vld [vmem:[#allocation5] sm:$0xf]  ;;  %v79_v4 = vld [vmem:[#allocation2] sm:$0xf]  ;;  %v481_v5 = vld [vmem:[#allocation7 + $0x30] sm:$0xff]  }
  0x35   :  { %431 = vmatprep.subr.bf16.mxu1 %v616_v0  ;;  %447 = vmatprep.mubr.msk.bf16.mxu1 %vm617_vm0, %v616_v0  ;;  %v94_v2 = vsel %vm92_vm1, %v80_v1, 0  ;;  %v480_v3 = vld [vmem:[#allocation7 + $0x38] sm:$0xff]   ;;  %v482_v6 = vld [vmem:[#allocation7 + $0x28] sm:$0xff]   ;;  %v483_v7 = vld [vmem:[#allocation7 + $0x20] sm:$0xff]  }
  0x36   :  { %426 = vmatpush3.bf16.msra.mxu0 %v94_v2  ;;  %432 = vmatpush3.bf16.msra.mxu1 %v480_v3  ;;  %v484_v8 = vld [vmem:[#allocation7 + $0x18] sm:$0xff]   ;;  %v485_v9 = vld [vmem:[#allocation7 + $0x10] sm:$0xff]   ;;  %v486_v10 = vld [vmem:[#allocation7 + $0x8] sm:$0xff]  }
  0x37   :  { %451 = vmatprep.subr.bf16.mxu0 %v616_v0  ;;  %433 = vmatprep.subr.bf16.mxu1 %v616_v0  ;;  %v487_v11 = vld [vmem:[#allocation7] sm:$0xff]   ;;  %v488_v12 = vld [vmem:[#allocation8 + $0x38] sm:$0xff]   ;;  %v489_v13 = vld [vmem:[#allocation8 + $0x30] sm:$0xff]  }
  0x38   :  { %v490_v14 = vld [vmem:[#allocation8 + $0x28] sm:$0xff]   ;;  %v385_v15 = vld [vmem:[%s708_s2] ss:$0 sm:$0xff]  ;;  %v491_v23 = vld [vmem:[#allocation8 + $0x20] sm:$0xff]  }
  0x39   :  { %428 = vmatmul.mubr.msk.bf16.vlgmr.msra.gmra.mxu0 %vm88_vm2, %v79_v4  ;;  %v492_v24 = vld [vmem:[#allocation8 + $0x18] sm:$0xff]   ;;  %v493_v25 = vld [vmem:[#allocation8 + $0x10] sm:$0xff]   ;;  %v494_v26 = vld [vmem:[#allocation8 + $0x8] sm:$0xff]  }
  0x3a   :  { %467 = vmatprep.mubr.msk.bf16.mxu0 %vm617_vm0, %v616_v0  ;;  %434 = vmatpush3.bf16.msra.mxu1 %v481_v5  ;;  %v495_v27 = vld [vmem:[#allocation8] sm:$0xff]   ;;  %v387_v28 = vld [vmem:[%s710_s4] ss:$0 sm:$0xff]  ;;  %s618_s4 = smov [#allocation10]  }
  0x3b   :  { %435 = vmatprep.subr.bf16.mxu1 %v616_v0  ;;  %452 = vmatpush3.bf16.msra.mxu0 %v488_v12  ;;  %v396_v36 = vld [vmem:[%s712_s6] ss:$0 sm:$0xff]  ;;  %s374_s24 = sshll.u32 %s618_s4, 4  ;;  %s375_s24 = int_to_ptr.vmem [resolvable:$true] %s374_s24 }
  0x3c   :  { %453 = vmatprep.subr.bf16.mxu0 %v616_v0  ;;  %s582_s25 = scalar_lea.vmem %s375_s24, 64  ;;  %p587_p7 = scmp.lt.s32.totalorder %s375_s24, %s375_s24 }
  0x3d   :  { %p583_p6 = scmp.ne.s32.totalorder %s375_s24, %s582_s25  ;;  %p588_p8 = scmp.lt.s32.totalorder %s582_s25, %s582_s25 }
  0x3e   :  { %436 = vmatpush3.bf16.msra.mxu1 %v482_v6 }
  0x3f   :  { %437 = vmatprep.subr.bf16.mxu1 %v616_v0  ;;  %454 = vmatpush3.bf16.msra.mxu0 %v489_v13  ;;  %p589_p9 = por %p588_p8, %p587_p7 }
  0x40   :  { %455 = vmatprep.subr.bf16.mxu0 %v616_v0 }
  0x41   :  { %p590_p10 = pnand %p589_p9, %p583_p6 }
  0x42   :  { %438 = vmatpush3.bf16.msra.mxu1 %v483_v7 }
  0x43   :  { %439 = vmatprep.subr.bf16.mxu1 %v616_v0  ;;  %456 = vmatpush3.bf16.msra.mxu0 %v490_v14 }
  0x44   :  { %457 = vmatprep.subr.bf16.mxu0 %v616_v0 }
  0x46   :  { %440 = vmatpush3.bf16.msra.mxu1 %v484_v8 }
  0x47   :  { %441 = vmatprep.subr.bf16.mxu1 %v616_v0  ;;  %458 = vmatpush3.bf16.msra.mxu0 %v491_v23 }
  0x48   :  { %459 = vmatprep.subr.bf16.mxu0 %v616_v0 }
  0x4a   :  { %442 = vmatpush3.bf16.msra.mxu1 %v485_v9 }
  0x4b   :  { %443 = vmatprep.subr.bf16.mxu1 %v616_v0  ;;  %460 = vmatpush3.bf16.msra.mxu0 %v492_v24 }
  0x4c   :  { %461 = vmatprep.subr.bf16.mxu0 %v616_v0 }
  0x4e   :  { %444 = vmatpush3.bf16.msra.mxu1 %v486_v10 }
  0x4f   :  { %445 = vmatprep.subr.bf16.mxu1 %v616_v0  ;;  %462 = vmatpush3.bf16.msra.mxu0 %v493_v25 }
  0x50   :  { %463 = vmatprep.subr.bf16.mxu0 %v616_v0 }
  0x52   :  { %446 = vmatpush3.bf16.msra.mxu1 %v487_v11 }
  0x53   :  { %464 = vmatpush3.bf16.msra.mxu0 %v494_v26 }
  0x54   :  { %465 = vmatprep.subr.bf16.mxu0 %v616_v0 }
  0x57   :  { %466 = vmatpush3.bf16.msra.mxu0 %v495_v27 }
  0xf9   :  { %v130_v16 = vpop.f32.mrf.mxu0 }
  0xfa   :  { %v131_v17 = vadd.f32 %v385_v15, %v130_v16 }
  0xfb   :  { %v429_v18 = vpop.f32.mrf.mxu0 }
  0xfc   :  { %496 = vtanh.f32 %v131_v17 }
  0xfd   :  { %v133_v19 = vpop.f32.mrf.mxu0 }
  0xff   :  { %v430_v20 = vpop.f32.mrf.mxu0 }
 0x109   :  { %v497_v21 = vpop.eup %496 }
 0x10a   :  { %v137_v22 = vpack.c.bf16 %v497_v21, %v497_v21 }
 0x10c   :  { %448 = vmatmul.mubr.bf16.vlgmr.msra.gmra.mxu1 %v137_v22 }
 0x1cc   :  { %v243_v29 = vpop.f32.mrf.mxu1 }
 0x1cd   :  { %v244_v30 = vadd.f32 %v387_v28, %v243_v29 }
 0x1ce   :  { %v449_v31 = vpop.f32.mrf.mxu1 }
 0x1cf   :  { %498 = vtanh.f32 %v244_v30 }
 0x1d0   :  { %v246_v32 = vpop.f32.mrf.mxu1 }
 0x1d2   :  { %v450_v33 = vpop.f32.mrf.mxu1 }
 0x1dc   :  { %v499_v34 = vpop.eup %498 }
 0x1dd   :  { %v250_v35 = vpack.c.bf16 %v499_v34, %v499_v34 }
 0x1df   :  { %468 = vmatmul.mubr.bf16.vlgmr.msra.gmra.mxu0 %v250_v35 }
 0x29f   :  { %v356_v37 = vpop.f32.mrf.mxu0 }
 0x2a0   :  { %v357_v38 = vadd.f32 %v396_v36, %v356_v37 }
 0x2a1   :  { %v469_v39 = vpop.f32.mrf.mxu0 }
 0x2a2   :  { %v362_v40 = vmul.f32 0.5, %v357_v38 }
 0x2a3   :  { %v359_v41 = vpop.f32.mrf.mxu0 }
 0x2a4   :  { %500 = vtanh.f32 %v362_v40 }
 0x2a5   :  { %v470_v42 = vpop.f32.mrf.mxu0 }
 0x2b1   :  { %v501_v43 = vpop.eup %500 }
 0x2b2   :  { %v364_v44 = vmul.f32 0.5, %v501_v43 }
 0x2b4   :  { %v365_v45 = vadd.f32 0.5, %v364_v44 }
 0x2b6   :  { %v366_v46 = vpack.c.bf16 %v365_v45, %v365_v45 }
 0x2b8   :  { %367 = vst [vmem:[#allocation10] sm:$0xf] %v366_v46 }
 0x2b9   :  { %593 = shalt.err (!%p590_p10)
}
 0x2ba   :  { %377 = dma.vmem_to_hbm [thread:$0]  %s375_s24, 64, %s713_s7, [#allocation4]  }
 0x2bb   :  { %608 = dma.done.wait [#allocation4], 64  }
 0x2bc   :  { %609 = vsyncadd [#allocation4], 4294967232 }
 0x2bd   :  { %381 = vsyncpa [#allocation3], 1 }
 0x2be   :  { %382 = vsyncpa [#allocation6], 1 }
 0x2bf   :  { %383 = vsyncpa [#allocation9], 1 }
 0x2c0   :  { %384 = vsyncpa [#allocation4], 1 }

</bundles_post_ra>
